<compile_context>
chip_gen: v6e
topology: v6e:2x2x1
jax: 0.10.0
libtpu: 0.0.40
codegen_flags: <defaults>
</compile_context>

<pallas_src>
import jax
import jax.numpy as jnp
from jax.experimental import pallas as pl
from jax.experimental.pallas import tpu as pltpu


def _round_up(x, m):
    return ((x + m - 1) // m) * m


# ----------------------------------------------------------------------------
# Pallas kernel: multi-hot @ folded-embedding-W1  ->  ReLU  ->  W2  ->  ReLU
#                -> fused output heads (lane-dense bf16 store)
# ----------------------------------------------------------------------------
def _make_kernel(n_feat, n_cond, offsets):
    """offsets[k] = starting row of embedding table k inside the folded M."""

    def kernel(*refs):
        pos = 0
        xt_ref = refs[pos]; pos += 1                  # (bm, n_feat) int32
        cond_ref = None
        if n_cond:
            cond_ref = refs[pos]; pos += 1            # (bm, n_cond) int32
        t_ref = refs[pos]; pos += 1                   # (bm, 1) int32
        (m_ref, b1_ref, w2_ref, b2_ref, wo_ref, bo_ref, out_ref) = refs[pos:]

        B = xt_ref.shape[0]
        Kp = m_ref.shape[0]
        iota = jax.lax.broadcasted_iota(jnp.int32, (B, Kp), 1)

        # Combined multi-hot: one hot entry per embedding, disjoint column
        # ranges (per-table offsets), built with cheap VPU compares/ORs.
        cols = []
        for i in range(n_feat):
            cols.append((xt_ref[:, i:i + 1], offsets[i]))
        for j in range(n_cond):
            cols.append((cond_ref[:, j:j + 1], offsets[n_feat + j]))
        cols.append((t_ref[:, 0:1], offsets[n_feat + n_cond]))

        idx0, off0 = cols[0]
        mask = (idx0 + off0) == iota
        for idx, off in cols[1:]:
            mask = jnp.logical_or(mask, (idx + off) == iota)
        onehot = mask.astype(jnp.bfloat16)

        # z1 = ReLU(h @ W1 + b1) with the embedding lookup folded into M.
        z1 = jnp.dot(onehot, m_ref[...],
                     preferred_element_type=jnp.float32) + b1_ref[...]
        z1 = jnp.maximum(z1, 0.0)
        # z2 = ReLU(z1 @ W2 + b2)
        z2 = jnp.dot(z1.astype(jnp.bfloat16), w2_ref[...],
                     preferred_element_type=jnp.float32) + b2_ref[...]
        z2 = jnp.maximum(z2, 0.0)
        # Fused output heads, lane-dense bf16 store (f32 accumulation).
        out = jnp.dot(z2.astype(jnp.bfloat16), wo_ref[...],
                      preferred_element_type=jnp.float32) + bo_ref[...]
        out_ref[...] = out.astype(out_ref.dtype)

    return kernel


def fused_forward(x_t, cond, t2d, m_table, b1, w2, b2, wo, bo, offsets,
                  block_rows=1024):
    """x_t: (B, n_feat) i32, cond: (B, n_cond) i32 or None, t2d: (B, 1) i32.

    Returns (B, O_pad) bf16 fused head logits (columns beyond the real head
    widths are zero/padding; callers slice with unpadded offsets)."""
    B = x_t.shape[0]
    n_feat = x_t.shape[1]
    n_cond = 0 if cond is None else cond.shape[1]
    Kp = m_table.shape[0]
    hidden = w2.shape[0]
    O = wo.shape[1]

    # Block size: big enough to amortize per-grid-step overhead, guarded so
    # the (bm, Kp) one-hot stays small even for very large vocabularies.
    bm = block_rows
    while bm > 128 and bm * Kp * 2 > (4 << 20):
        bm //= 2

    if B <= bm:
        bm = B
        Bp = B
    else:
        Bp = _round_up(B, bm)
    nb = Bp // bm

    if Bp != B:  # pad batch (index 0 is valid for every table), slice back later
        pad = Bp - B
        x_t = jnp.pad(x_t, ((0, pad), (0, 0)))
        if cond is not None:
            cond = jnp.pad(cond, ((0, pad), (0, 0)))
        t2d = jnp.pad(t2d, ((0, pad), (0, 0)))

    def batch_spec(last):
        return pl.BlockSpec((bm, last), lambda i: (i, 0))

    def const_spec(shape):
        # Constant block index -> weight tiles stay VMEM-resident across steps.
        return pl.BlockSpec(shape, lambda i: (0,) * len(shape))

    inputs = [x_t]
    in_specs = [batch_spec(n_feat)]
    if n_cond:
        inputs.append(cond)
        in_specs.append(batch_spec(n_cond))
    inputs.append(t2d)
    in_specs.append(batch_spec(1))
    for p in (m_table, b1, w2, b2, wo, bo):
        inputs.append(p)
        in_specs.append(const_spec(p.shape))

    flops = 2 * Bp * (Kp * hidden + hidden * hidden + hidden * O)
    bytes_accessed = sum(int(a.nbytes) for a in inputs) + Bp * O * 2
    cost = pl.CostEstimate(flops=flops, transcendentals=0,
                           bytes_accessed=bytes_accessed)

    if nb > 1 and hasattr(pltpu, "CORE_PARALLEL"):
        # Split batch blocks across v7x's two TensorCores (no-op on 1-TC chips).
        sem = (pltpu.CORE_PARALLEL,)
    else:
        sem = ("parallel",)

    out = pl.pallas_call(
        _make_kernel(n_feat, n_cond, offsets),
        out_shape=jax.ShapeDtypeStruct((Bp, O), jnp.bfloat16),
        grid=(nb,),
        in_specs=in_specs,
        out_specs=batch_spec(O),
        compiler_params=pltpu.CompilerParams(dimension_semantics=sem),
        cost_estimate=cost,
    )(*inputs)
    return out[:B] if Bp != B else out


# ----------------------------------------------------------------------------
# Model: parameter construction + forward
# ----------------------------------------------------------------------------
class TripDiffusionModelPallas:
    def __init__(self, features_info, cond_info, T, key, block_rows=1024):
        self.features_info = features_info
        self.cond_info = cond_info
        self.T = T
        self.block_rows = block_rows
        hidden_dim = 256

        def normal(key, shape, scale=0.05):
            return (scale * jax.random.normal(key, shape)).astype(jnp.float32)

        n_keys = len(features_info) + len(cond_info) + 8
        keys = iter(jax.random.split(key, max(n_keys, 16)))

        # Embedding tables (built in f32; folded into W1 below).
        tables = []
        embed_dims = []
        for feat in features_info:
            num_classes = feat['num_classes']
            embed_dim = 16
            if feat['type'] == 'ordinal' and num_classes > 100:
                embed_dim = 32
            tables.append(normal(next(keys), (num_classes, embed_dim), scale=1.0))
            embed_dims.append(embed_dim)
        for cond in cond_info:
            tables.append(normal(next(keys), (cond['num_classes'], 8), scale=1.0))
            embed_dims.append(8)
        tables.append(normal(next(keys), (T + 1, 64), scale=1.0))   # time
        embed_dims.append(64)

        input_dim = sum(embed_dims)

        # Trunk first layer (stored (in, out)); folded with the tables:
        #   h @ W1 = sum_i onehot_i @ (table_i @ W1[rows_i])  =  multihot @ M
        w1 = normal(next(keys), (input_dim, hidden_dim))
        m_parts = []
        self.offsets = []          # one-hot column offset per embedding table
        dim_off = 0
        class_off = 0
        for tbl, edim in zip(tables, embed_dims):
            self.offsets.append(class_off)
            m_parts.append(jnp.dot(tbl, w1[dim_off:dim_off + edim],
                                   precision=jax.lax.Precision.HIGHEST,
                                   preferred_element_type=jnp.float32))
            dim_off += edim
            class_off += tbl.shape[0]
        k_total = class_off
        k_pad = _round_up(k_total, 128)
        M = jnp.concatenate(m_parts, axis=0)
        if k_pad != k_total:       # K padding baked in as zero rows (never hot)
            M = jnp.concatenate(
                [M, jnp.zeros((k_pad - k_total, hidden_dim), jnp.float32)], axis=0)
        self.m_table = M.astype(jnp.bfloat16)

        self.b1 = normal(next(keys), (1, hidden_dim))
        self.w2 = normal(next(keys), (hidden_dim, hidden_dim)).astype(jnp.bfloat16)
        self.b2 = normal(next(keys), (1, hidden_dim))

        # Output heads fused into one wide linear, zero-padded to a lane
        # multiple so stores are lane-dense; padded logits are never read.
        self.head_sizes = [f['num_classes'] for f in features_info]
        total_out = sum(self.head_sizes)
        total_out_pad = _round_up(total_out, 128)
        pad_out = total_out_pad - total_out
        wo = normal(next(keys), (hidden_dim, total_out))
        bo = normal(next(keys), (1, total_out))
        if pad_out:
            wo = jnp.concatenate(
                [wo, jnp.zeros((hidden_dim, pad_out), jnp.float32)], axis=1)
            bo = jnp.concatenate(
                [bo, jnp.zeros((1, pad_out), jnp.float32)], axis=1)
        self.wo = wo.astype(jnp.bfloat16)
        self.bo = bo

        self.n_cond = len(cond_info)

        # NOTE: the PyTorch __init__ also builds beta/sigma schedules,
        # transition matrices and posteriors; none are used in forward().
        # TODO(synk): add the diffusion transition/posterior tensors if a
        # sampling path (q_posterior etc.) is ever needed.

    def forward(self, x_t, cond, t):
        """
        x_t:  (batch, num_features) int32
        cond: (batch, num_cond)     int32
        t:    (batch,)              int32
        Returns dict of logits, one (batch, num_classes) f32 array per feature.
        """
        B = x_t.shape[0]
        t2d = jnp.reshape(t.astype(jnp.int32), (B, 1))
        cond_i = cond.astype(jnp.int32) if self.n_cond else None

        fused = fused_forward(
            x_t.astype(jnp.int32), cond_i, t2d,
            self.m_table, self.b1, self.w2, self.b2, self.wo, self.bo,
            self.offsets, block_rows=self.block_rows)

        # Split the fused head output per feature (original, unpadded offsets).
        logits = {}
        offset = 0
        for feat, size in zip(self.features_info, self.head_sizes):
            logits[feat['name']] = fused[:, offset:offset + size].astype(jnp.float32)
            offset += size
        return logits


# ----------------------------------------------------------------------------
# Example run
# ----------------------------------------------------------------------------
if __name__ == "__main__":
    features_info = [
        {'name': 'mode',     'type': 'categorical', 'num_classes': 10},
        {'name': 'distance', 'type': 'ordinal',     'num_classes': 128},  # > 100 -> embed 32
    ]
    cond_info = [
        {'name': 'weekday', 'num_classes': 7},
        {'name': 'weather', 'num_classes': 5},
    ]
    T = 8
    batch = 8

    key = jax.random.PRNGKey(0)
    k_model, k_x, k_c, k_t = jax.random.split(key, 4)

    model = TripDiffusionModelPallas(features_info, cond_info, T, k_model)

    x_t = jnp.stack(
        [jax.random.randint(jax.random.fold_in(k_x, i), (batch,), 0,
                            features_info[i]['num_classes'])
         for i in range(len(features_info))], axis=1).astype(jnp.int32)
    cond = jnp.stack(
        [jax.random.randint(jax.random.fold_in(k_c, j), (batch,), 0,
                            cond_info[j]['num_classes'])
         for j in range(len(cond_info))], axis=1).astype(jnp.int32)
    t = jax.random.randint(k_t, (batch,), 1, T + 1).astype(jnp.int32)

    logits = model.forward(x_t, cond, t)
    logits = jax.block_until_ready(logits)

    # sanity: shapes match the PyTorch module's contract and values are finite
    assert logits['mode'].shape == (batch, 10)
    assert logits['distance'].shape == (batch, 128)
    assert all(bool(jnp.all(jnp.isfinite(v))) for v in logits.values())

    print("KERNEL_OK")
</pallas_src>

<mosaic_0001>
module attributes {stable_mosaic.version = 11 : i64} {
  func.func @kernel(%arg0: i32, %arg1: memref<8x2xi32, #tpu.memory_space<vmem>>, %arg2: memref<8x2xi32, #tpu.memory_space<vmem>>, %arg3: memref<8x1xi32, #tpu.memory_space<vmem>>, %arg4: memref<256x256xbf16, #tpu.memory_space<vmem>>, %arg5: memref<1x256xf32, #tpu.memory_space<vmem>>, %arg6: memref<256x256xbf16, #tpu.memory_space<vmem>>, %arg7: memref<1x256xf32, #tpu.memory_space<vmem>>, %arg8: memref<256x256xbf16, #tpu.memory_space<vmem>>, %arg9: memref<1x256xf32, #tpu.memory_space<vmem>>, %arg10: memref<8x256xbf16, #tpu.memory_space<vmem>>) attributes {dimension_semantics = [#tpu.dimension_semantics<parallel>], iteration_bounds = array<i64: 1>, scalar_prefetch = 0 : i64, scratch_operands = 0 : i64, tpu.core_type = #tpu.core_type<tc>, window_params = [{transform_indices = @transform_0, window_bounds = array<i64: 8, 2>}, {transform_indices = @transform_1, window_bounds = array<i64: 8, 2>}, {transform_indices = @transform_2, window_bounds = array<i64: 8, 1>}, {pipeline_mode = #tpu.pipeline_mode<synchronous>, transform_indices = @transform_3, window_bounds = array<i64: 256, 256>}, {pipeline_mode = #tpu.pipeline_mode<synchronous>, transform_indices = @transform_4, window_bounds = array<i64: 1, 256>}, {pipeline_mode = #tpu.pipeline_mode<synchronous>, transform_indices = @transform_5, window_bounds = array<i64: 256, 256>}, {pipeline_mode = #tpu.pipeline_mode<synchronous>, transform_indices = @transform_6, window_bounds = array<i64: 1, 256>}, {pipeline_mode = #tpu.pipeline_mode<synchronous>, transform_indices = @transform_7, window_bounds = array<i64: 256, 256>}, {pipeline_mode = #tpu.pipeline_mode<synchronous>, transform_indices = @transform_8, window_bounds = array<i64: 1, 256>}, {transform_indices = @transform_9, window_bounds = array<i64: 8, 256>}]} {
    %0 = tpu.iota {dimensions = array<i32: 1>} : vector<8x256xi32>
    %c0 = arith.constant 0 : index
    %c0_0 = arith.constant 0 : index
    %1 = vector.load %arg1[%c0, %c0_0] : memref<8x2xi32, #tpu.memory_space<vmem>>, vector<8x1xi32>
    %c0_1 = arith.constant 0 : index
    %c1 = arith.constant 1 : index
    %2 = vector.load %arg1[%c0_1, %c1] : memref<8x2xi32, #tpu.memory_space<vmem>>, vector<8x1xi32>
    %c0_2 = arith.constant 0 : index
    %c0_3 = arith.constant 0 : index
    %3 = vector.load %arg2[%c0_2, %c0_3] : memref<8x2xi32, #tpu.memory_space<vmem>>, vector<8x1xi32>
    %c0_4 = arith.constant 0 : index
    %c1_5 = arith.constant 1 : index
    %4 = vector.load %arg2[%c0_4, %c1_5] : memref<8x2xi32, #tpu.memory_space<vmem>>, vector<8x1xi32>
    %c0_6 = arith.constant 0 : index
    %c0_7 = arith.constant 0 : index
    %5 = vector.load %arg3[%c0_6, %c0_7] : memref<8x1xi32, #tpu.memory_space<vmem>>, vector<8x1xi32>
    %c0_i32 = arith.constant 0 : i32
    %6 = vector.broadcast %c0_i32 : i32 to vector<8x1xi32>
    %7 = arith.addi %1, %6 : vector<8x1xi32>
    %8 = vector.broadcast %7 : vector<8x1xi32> to vector<8x256xi32>
    %9 = arith.cmpi eq, %8, %0 : vector<8x256xi32>
    %c10_i32 = arith.constant 10 : i32
    %10 = vector.broadcast %c10_i32 : i32 to vector<8x1xi32>
    %11 = arith.addi %2, %10 : vector<8x1xi32>
    %12 = vector.broadcast %11 : vector<8x1xi32> to vector<8x256xi32>
    %13 = arith.cmpi eq, %12, %0 : vector<8x256xi32>
    %14 = arith.ori %9, %13 : vector<8x256xi1>
    %c138_i32 = arith.constant 138 : i32
    %15 = vector.broadcast %c138_i32 : i32 to vector<8x1xi32>
    %16 = arith.addi %3, %15 : vector<8x1xi32>
    %17 = vector.broadcast %16 : vector<8x1xi32> to vector<8x256xi32>
    %18 = arith.cmpi eq, %17, %0 : vector<8x256xi32>
    %19 = arith.ori %14, %18 : vector<8x256xi1>
    %c145_i32 = arith.constant 145 : i32
    %20 = vector.broadcast %c145_i32 : i32 to vector<8x1xi32>
    %21 = arith.addi %4, %20 : vector<8x1xi32>
    %22 = vector.broadcast %21 : vector<8x1xi32> to vector<8x256xi32>
    %23 = arith.cmpi eq, %22, %0 : vector<8x256xi32>
    %24 = arith.ori %19, %23 : vector<8x256xi1>
    %c150_i32 = arith.constant 150 : i32
    %25 = vector.broadcast %c150_i32 : i32 to vector<8x1xi32>
    %26 = arith.addi %5, %25 : vector<8x1xi32>
    %27 = vector.broadcast %26 : vector<8x1xi32> to vector<8x256xi32>
    %28 = arith.cmpi eq, %27, %0 : vector<8x256xi32>
    %29 = arith.ori %24, %28 : vector<8x256xi1>
    %30 = arith.extui %29 : vector<8x256xi1> to vector<8x256xi32>
    %31 = arith.sitofp %30 : vector<8x256xi32> to vector<8x256xf32>
    %32 = arith.truncf %31 : vector<8x256xf32> to vector<8x256xbf16>
    %c0_8 = arith.constant 0 : index
    %c0_9 = arith.constant 0 : index
    %33 = vector.load %arg4[%c0_8, %c0_9] : memref<256x256xbf16, #tpu.memory_space<vmem>>, vector<256x256xbf16>
    %cst = arith.constant dense<0.000000e+00> : vector<8x256xf32>
    %34 = tpu.matmul %32, %33, %cst {dimension_numbers = #tpu.dot_dimension_numbers<[1], [0], [0], [1], [0, 0, 1, 1], [], []>} : vector<8x256xbf16>, vector<256x256xbf16>, vector<8x256xf32> -> vector<8x256xf32>
    %c0_10 = arith.constant 0 : index
    %c0_11 = arith.constant 0 : index
    %35 = vector.load %arg5[%c0_10, %c0_11] : memref<1x256xf32, #tpu.memory_space<vmem>>, vector<1x256xf32>
    %36 = vector.broadcast %35 : vector<1x256xf32> to vector<8x256xf32>
    %37 = arith.addf %34, %36 : vector<8x256xf32>
    %cst_12 = arith.constant 0.000000e+00 : f32
    %38 = vector.broadcast %cst_12 : f32 to vector<8x256xf32>
    %39 = arith.maximumf %37, %38 : vector<8x256xf32>
    %40 = arith.truncf %39 : vector<8x256xf32> to vector<8x256xbf16>
    %c0_13 = arith.constant 0 : index
    %c0_14 = arith.constant 0 : index
    %41 = vector.load %arg6[%c0_13, %c0_14] : memref<256x256xbf16, #tpu.memory_space<vmem>>, vector<256x256xbf16>
    %cst_15 = arith.constant dense<0.000000e+00> : vector<8x256xf32>
    %42 = tpu.matmul %40, %41, %cst_15 {dimension_numbers = #tpu.dot_dimension_numbers<[1], [0], [0], [1], [0, 0, 1, 1], [], []>} : vector<8x256xbf16>, vector<256x256xbf16>, vector<8x256xf32> -> vector<8x256xf32>
    %c0_16 = arith.constant 0 : index
    %c0_17 = arith.constant 0 : index
    %43 = vector.load %arg7[%c0_16, %c0_17] : memref<1x256xf32, #tpu.memory_space<vmem>>, vector<1x256xf32>
    %44 = vector.broadcast %43 : vector<1x256xf32> to vector<8x256xf32>
    %45 = arith.addf %42, %44 : vector<8x256xf32>
    %cst_18 = arith.constant 0.000000e+00 : f32
    %46 = vector.broadcast %cst_18 : f32 to vector<8x256xf32>
    %47 = arith.maximumf %45, %46 : vector<8x256xf32>
    %48 = arith.truncf %47 : vector<8x256xf32> to vector<8x256xbf16>
    %c0_19 = arith.constant 0 : index
    %c0_20 = arith.constant 0 : index
    %49 = vector.load %arg8[%c0_19, %c0_20] : memref<256x256xbf16, #tpu.memory_space<vmem>>, vector<256x256xbf16>
    %cst_21 = arith.constant dense<0.000000e+00> : vector<8x256xf32>
    %50 = tpu.matmul %48, %49, %cst_21 {dimension_numbers = #tpu.dot_dimension_numbers<[1], [0], [0], [1], [0, 0, 1, 1], [], []>} : vector<8x256xbf16>, vector<256x256xbf16>, vector<8x256xf32> -> vector<8x256xf32>
    %c0_22 = arith.constant 0 : index
    %c0_23 = arith.constant 0 : index
    %51 = vector.load %arg9[%c0_22, %c0_23] : memref<1x256xf32, #tpu.memory_space<vmem>>, vector<1x256xf32>
    %52 = vector.broadcast %51 : vector<1x256xf32> to vector<8x256xf32>
    %53 = arith.addf %50, %52 : vector<8x256xf32>
    %54 = arith.truncf %53 : vector<8x256xf32> to vector<8x256xbf16>
    %c0_24 = arith.constant 0 : index
    %c0_25 = arith.constant 0 : index
    %55 = vector.load %arg10[%c0_24, %c0_25] : memref<8x256xbf16, #tpu.memory_space<vmem>>, vector<8x256xbf16>
    tpu.vector_store %arg10[%c0_24, %c0_25], %54 {strides = array<i32>} : memref<8x256xbf16, #tpu.memory_space<vmem>>, vector<8x256xbf16>,
    return
  }
  func.func @transform_0(%arg0: i32) -> (i32, i32) {
    %c0_i32 = arith.constant 0 : i32
    %c0_i32_0 = arith.constant 0 : i32
    return %arg0, %c0_i32 : i32, i32
  }
  func.func @transform_1(%arg0: i32) -> (i32, i32) {
    %c0_i32 = arith.constant 0 : i32
    %c0_i32_0 = arith.constant 0 : i32
    return %arg0, %c0_i32 : i32, i32
  }
  func.func @transform_2(%arg0: i32) -> (i32, i32) {
    %c0_i32 = arith.constant 0 : i32
    %c0_i32_0 = arith.constant 0 : i32
    return %arg0, %c0_i32 : i32, i32
  }
  func.func @transform_3(%arg0: i32) -> (i32, i32) {
    %c0_i32 = arith.constant 0 : i32
    %c0_i32_0 = arith.constant 0 : i32
    %c0_i32_1 = arith.constant 0 : i32
    return %c0_i32, %c0_i32_0 : i32, i32
  }
  func.func @transform_4(%arg0: i32) -> (i32, i32) {
    %c0_i32 = arith.constant 0 : i32
    %c0_i32_0 = arith.constant 0 : i32
    %c0_i32_1 = arith.constant 0 : i32
    return %c0_i32, %c0_i32_0 : i32, i32
  }
  func.func @transform_5(%arg0: i32) -> (i32, i32) {
    %c0_i32 = arith.constant 0 : i32
    %c0_i32_0 = arith.constant 0 : i32
    %c0_i32_1 = arith.constant 0 : i32
    return %c0_i32, %c0_i32_0 : i32, i32
  }
  func.func @transform_6(%arg0: i32) -> (i32, i32) {
    %c0_i32 = arith.constant 0 : i32
    %c0_i32_0 = arith.constant 0 : i32
    %c0_i32_1 = arith.constant 0 : i32
    return %c0_i32, %c0_i32_0 : i32, i32
  }
  func.func @transform_7(%arg0: i32) -> (i32, i32) {
    %c0_i32 = arith.constant 0 : i32
    %c0_i32_0 = arith.constant 0 : i32
    %c0_i32_1 = arith.constant 0 : i32
    return %c0_i32, %c0_i32_0 : i32, i32
  }
  func.func @transform_8(%arg0: i32) -> (i32, i32) {
    %c0_i32 = arith.constant 0 : i32
    %c0_i32_0 = arith.constant 0 : i32
    %c0_i32_1 = arith.constant 0 : i32
    return %c0_i32, %c0_i32_0 : i32, i32
  }
  func.func @transform_9(%arg0: i32) -> (i32, i32) {
    %c0_i32 = arith.constant 0 : i32
    %c0_i32_0 = arith.constant 0 : i32
    return %arg0, %c0_i32 : i32, i32
  }
}

</mosaic_0001>

<bundles_post_ra>
// kernel: tpu_custom_call.1
= control target key start
LH: loop header
LB: loop body
LE: loop exit
PB: predicated region body
PF: predicated region fallthrough
CT: control target
= control target key end

     0   :  { %14 = vsyncpa [#allocation3], 0  ;;  %s1327_s0 = inlined_call_operand.vmem [shape: s32[8,2], index: 0, kind: input, shape index: {}]   ;;  %s1328_s1 = inlined_call_operand.vmem [shape: s32[8,2], index: 1, kind: input, shape index: {}]   ;;  %s1329_s2 = inlined_call_operand.vmem [shape: s32[8,1], index: 2, kind: input, shape index: {}]   ;;  %s1330_s3 = inlined_call_operand.hbm [shape: bf16[256,256], index: 3, kind: input, shape index: {}]   ;;  %s1331_s4 = inlined_call_operand.vmem [shape: f32[1,256], index: 4, kind: input, shape index: {}]   ;;  %s1332_s5 = inlined_call_operand.hbm [shape: bf16[256,256], index: 5, kind: input, shape index: {}]   ;;  %s1333_s6 = inlined_call_operand.vmem [shape: f32[1,256], index: 6, kind: input, shape index: {}]   ;;  %s1334_s7 = inlined_call_operand.hbm [shape: bf16[256,256], index: 7, kind: input, shape index: {}]   ;;  %s1335_s8 = inlined_call_operand.vmem [shape: f32[1,256], index: 8, kind: input, shape index: {}]   ;;  %s1336_s9 = inlined_call_operand.hbm [shape: bf16[8,256], index: 9, kind: output, shape index: {}]  }
   0x1   :  { %15 = vsyncpa [#allocation6], 0 }
   0x2   :  { %16 = vsyncpa [#allocation4], 0  ;;  %s1236_s30 = smov [#allocation5]   ;;  %s1237_s11 = smov [#allocation2]  }
   0x3   :  { %s42_s10 = sshll.u32 %s1236_s30, 4  ;;  %s28_s12 = sshll.u32 %s1237_s11, 4  ;;  %s43_s10 = int_to_ptr.vmem [resolvable:$true] %s42_s10  ;;  %s29_s12 = int_to_ptr.vmem [resolvable:$true] %s28_s12 }
   0x4   :  { %s1158_s13 = scalar_lea.vmem %s43_s10, 4096  ;;  %p1163_p1 = scmp.lt.s32.totalorder %s43_s10, %s43_s10 }
   0x5   :  { %p1159_p0 = scmp.ne.s32.totalorder %s43_s10, %s1158_s13  ;;  %p1164_p2 = scmp.lt.s32.totalorder %s1158_s13, %s1158_s13 }
   0x7   :  { %p1165_p3 = por %p1164_p2, %p1163_p1 }
   0x9   :  { %p1166_p4 = pnand %p1165_p3, %p1159_p0 }
   0xb   :  { %1169 = shalt.err (!%p1166_p4)
}
   0xc   :  { %s1238_s14 = smov 128   ;;  %s1239_s15 = smov 8  }
   0xd   :  { %48 = dma.hbm_to_vmem [thread:$0]  %s1332_s5, 4096, %s43_s10, [#allocation6], %s1238_s14, %s1238_s14, %s1239_s15  }
   0xe   :  { %s1178_s18 = scalar_lea.vmem %s29_s12, 4096  ;;  %p1183_p6 = scmp.lt.s32.totalorder %s29_s12, %s29_s12 }
   0xf   :  { %p1179_p5 = scmp.ne.s32.totalorder %s29_s12, %s1178_s18  ;;  %p1184_p7 = scmp.lt.s32.totalorder %s1178_s18, %s1178_s18 }
  0x11   :  { %p1185_p8 = por %p1184_p7, %p1183_p6 }
  0x13   :  { %p1186_p9 = pnand %p1185_p8, %p1179_p5 }
  0x15   :  { %1189 = shalt.err (!%p1186_p9)
}
  0x16   :  { %34 = dma.hbm_to_vmem [thread:$0]  %s1330_s3, 4096, %s29_s12, [#allocation3], %s1238_s14, %s1238_s14, %s1239_s15  }
  0x17   :  { %s1240_s21 = smov [#allocation7]  }
  0x18   :  { %s56_s22 = sshll.u32 %s1240_s21, 4  ;;  %s57_s22 = int_to_ptr.vmem [resolvable:$true] %s56_s22 }
  0x19   :  { %s1198_s23 = scalar_lea.vmem %s57_s22, 4096  ;;  %p1203_p11 = scmp.lt.s32.totalorder %s57_s22, %s57_s22 }
  0x1a   :  { %p1199_p10 = scmp.ne.s32.totalorder %s57_s22, %s1198_s23  ;;  %p1204_p12 = scmp.lt.s32.totalorder %s1198_s23, %s1198_s23 }
  0x1c   :  { %p1205_p13 = por %p1204_p12, %p1203_p11 }
  0x1e   :  { %p1206_p0 = pnand %p1205_p13, %p1199_p10 }
  0x20   :  { %1209 = shalt.err (!%p1206_p0)
}
  0x21   :  { %62 = dma.hbm_to_vmem [thread:$0]  %s1334_s7, 4096, %s57_s22, [#allocation6], %s1238_s14, %s1238_s14, %s1239_s15  }
  0x22   :  { %1230 = dma.done.wait [#allocation3], 4096  }
  0x23   :  { %1231 = vsyncadd [#allocation3], 4294963200 }
  0x24   :  { %1232 = dma.done.wait [#allocation6], 8192  }
  0x25   :  { %1233 = vsyncadd [#allocation6], 4294959104  ;;  %v1241_v0 = vmov 0   ;;  %v77_v1 = vld [vmem:[%s1327_s0] sm:$0xff]  ;;  %v1006_v5 = vld [vmem:[#allocation2 + $0x74] ss:$8 sps:$4 sm:$0xff]  }
  0x26   :  { %1000 = vset.pattern.permute.xlu0 %v1241_v0  ;;  %1002 = vset.pattern.permute.xlu1 %v1241_v0  ;;  %v78_v2 = vld [vmem:[%s1328_s1] sm:$0xff]  ;;  %v85_v4 = vadd.s32 10, %v77_v1  ;;  %v1008_v6 = vld [vmem:[#allocation2 + $0x70] ss:$8 sps:$4 sm:$0xff]   ;;  %v1242_v9 = vmov 1  }
  0x27   :  { %81 = vperm.xlu0 %1000, %v77_v1   ;;  %v93_v3 = vadd.s32 138, %v78_v2  ;;  %v1009_v7 = vld [vmem:[#allocation2 + $0x64] ss:$8 sps:$4 sm:$0xff]   ;;  %v101_v8 = vadd.s32 145, %v78_v2  ;;  %327 = vmatprep.subr.bf16.mxu0 %v1006_v5  ;;  %v1011_v10 = vld [vmem:[#allocation2 + $0x60] ss:$8 sps:$4 sm:$0xff]   ;;  %v74_v5 = vlaneseq }
  0x28   :  { %328 = vmatpush1.bf16.msra.mxu0 %v1008_v6  ;;  %v79_v11 = vld [vmem:[%s1329_s2] sm:$0xff]  ;;  %v1012_v12 = vld [vmem:[#allocation2 + $0x54] ss:$8 sps:$4 sm:$0xff]   ;;  %v1014_v14 = vld [vmem:[#allocation2 + $0x50] ss:$8 sps:$4 sm:$0xff]  }
  0x29   :  { %95 = vperm.xlu1 %1002, %v93_v3   ;;  %329 = vmatprep.subr.bf16.mxu0 %v1009_v7  ;;  %v109_v13 = vadd.s32 150, %v79_v11  ;;  %v1015_v15 = vld [vmem:[#allocation2 + $0x44] ss:$8 sps:$4 sm:$0xff]   ;;  %v1017_v16 = vld [vmem:[#allocation2 + $0x40] ss:$8 sps:$4 sm:$0xff]   ;;  %v75_v6 = vand.u32 127, %v74_v5 }
  0x2a   :  { %v1018_v17 = vld [vmem:[#allocation2 + $0x34] ss:$8 sps:$4 sm:$0xff]   ;;  %v1020_v18 = vld [vmem:[#allocation2 + $0x30] ss:$8 sps:$4 sm:$0xff]   ;;  %v1021_v19 = vld [vmem:[#allocation2 + $0x24] ss:$8 sps:$4 sm:$0xff]  }
  0x2b   :  { %1001 = vset.pattern.permute.xlu0 %v1242_v9  ;;  %v1023_v20 = vld [vmem:[#allocation2 + $0x20] ss:$8 sps:$4 sm:$0xff]   ;;  %v1024_v21 = vld [vmem:[#allocation2 + $0x14] ss:$8 sps:$4 sm:$0xff]   ;;  %v1056_v23 = vld [vmem:[#allocation5 + $0x70] ss:$8 sps:$4 sm:$0xff]  }
  0x2c   :  { %87 = vperm.xlu0 %1001, %v85_v4   ;;  %330 = vmatpush1.bf16.msra.mxu0 %v1011_v10  ;;  %v1054_v22 = vld [vmem:[#allocation5 + $0x74] ss:$8 sps:$4 sm:$0xff]   ;;  %v1057_v24 = vld [vmem:[#allocation5 + $0x64] ss:$8 sps:$4 sm:$0xff]   ;;  %v1026_v25 = vld [vmem:[#allocation2 + $0x10] ss:$8 sps:$4 sm:$0xff]  }
  0x2d   :  { %1003 = vset.pattern.permute.xlu1 %v1242_v9  ;;  %331 = vmatprep.subr.bf16.mxu0 %v1012_v12  ;;  %v1027_v26 = vld [vmem:[#allocation2 + $0x4] ss:$8 sps:$4 sm:$0xff]   ;;  %v1059_v27 = vld [vmem:[#allocation5 + $0x60] ss:$8 sps:$4 sm:$0xff]   ;;  %v1060_v28 = vld [vmem:[#allocation5 + $0x54] ss:$8 sps:$4 sm:$0xff]  }
  0x2e   :  { %103 = vperm.xlu1 %1003, %v101_v8   ;;  %576 = vmatprep.subr.bf16.mxu1 %v1054_v22  ;;  %v1029_v29 = vld [vmem:[#allocation2] ss:$8 sps:$4 sm:$0xff]   ;;  %v1030_v30 = vld [vmem:[#allocation2 + $0xf4] ss:$8 sps:$4 sm:$0xff]   ;;  %v1062_v31 = vld [vmem:[#allocation5 + $0x50] ss:$8 sps:$4 sm:$0xff]  }
  0x2f   :  { %577 = vmatpush1.bf16.msra.mxu1 %v1056_v23  ;;  %v1063_v32 = vld [vmem:[#allocation5 + $0x44] ss:$8 sps:$4 sm:$0xff]   ;;  %v1032_v33 = vld [vmem:[#allocation2 + $0xf0] ss:$8 sps:$4 sm:$0xff]   ;;  %v1065_v35 = vld [vmem:[#allocation5 + $0x40] ss:$8 sps:$4 sm:$0xff]  }
  0x30   :  { %1005 = vset.pattern.permute.xlu0 %v1241_v0  ;;  %332 = vmatpush1.bf16.msra.mxu0 %v1014_v14  ;;  %v1033_v34 = vld [vmem:[#allocation2 + $0xe4] ss:$8 sps:$4 sm:$0xff]   ;;  %v1066_v36 = vld [vmem:[#allocation5 + $0x34] ss:$8 sps:$4 sm:$0xff]   ;;  %v1035_v37 = vld [vmem:[#allocation2 + $0xe0] ss:$8 sps:$4 sm:$0xff]  }
  0x31   :  { %333 = vmatprep.subr.bf16.mxu0 %v1015_v15  ;;  %578 = vmatprep.subr.bf16.mxu1 %v1057_v24  ;;  %v1036_v38 = vld [vmem:[#allocation2 + $0xd4] ss:$8 sps:$4 sm:$0xff]   ;;  %v1068_v39 = vld [vmem:[#allocation5 + $0x30] ss:$8 sps:$4 sm:$0xff]   ;;  %v1069_v41 = vld [vmem:[#allocation5 + $0x24] ss:$8 sps:$4 sm:$0xff]  }
  0x32   :  { %1004 = vset.pattern.permute.xlu1 %v1241_v0  ;;  %v1038_v40 = vld [vmem:[#allocation2 + $0xd0] ss:$8 sps:$4 sm:$0xff]   ;;  %v1039_v42 = vld [vmem:[#allocation2 + $0xc4] ss:$8 sps:$4 sm:$0xff]   ;;  %v1071_v43 = vld [vmem:[#allocation5 + $0x20] ss:$8 sps:$4 sm:$0xff]  }
  0x33   :  { %111 = vperm.xlu1 %1004, %v109_v13   ;;  %579 = vmatpush1.bf16.msra.mxu1 %v1059_v27  ;;  %v1072_v44 = vld [vmem:[#allocation5 + $0x14] ss:$8 sps:$4 sm:$0xff]   ;;  %v1041_v45 = vld [vmem:[#allocation2 + $0xc0] ss:$8 sps:$4 sm:$0xff]   ;;  %v1074_v47 = vld [vmem:[#allocation5 + $0x10] ss:$8 sps:$4 sm:$0xff]  }
  0x34   :  { %334 = vmatpush1.bf16.msra.mxu0 %v1017_v16  ;;  %580 = vmatprep.subr.bf16.mxu1 %v1060_v28  ;;  %v1042_v46 = vld [vmem:[#allocation2 + $0xb4] ss:$8 sps:$4 sm:$0xff]   ;;  %v1075_v48 = vld [vmem:[#allocation5 + $0x4] ss:$8 sps:$4 sm:$0xff]   ;;  %v1044_v49 = vld [vmem:[#allocation2 + $0xb0] ss:$8 sps:$4 sm:$0xff]  }
  0x35   :  { %335 = vmatprep.subr.bf16.mxu0 %v1018_v17  ;;  %v1045_v50 = vld [vmem:[#allocation2 + $0xa4] ss:$8 sps:$4 sm:$0xff]   ;;  %v1077_v51 = vld [vmem:[#allocation5] ss:$8 sps:$4 sm:$0xff]   ;;  %v1078_v52 = vld [vmem:[#allocation5 + $0xf4] ss:$8 sps:$4 sm:$0xff]  }
  0x36   :  { %v1047_v53 = vld [vmem:[#allocation2 + $0xa0] ss:$8 sps:$4 sm:$0xff]   ;;  %v1048_v54 = vld [vmem:[#allocation2 + $0x94] ss:$8 sps:$4 sm:$0xff]   ;;  %v1080_v55 = vld [vmem:[#allocation5 + $0xf0] ss:$8 sps:$4 sm:$0xff]  }
  0x37   :  { %581 = vmatpush1.bf16.msra.mxu1 %v1062_v31  ;;  %v1081_v56 = vld [vmem:[#allocation5 + $0xe4] ss:$8 sps:$4 sm:$0xff]   ;;  %v1050_v57 = vld [vmem:[#allocation2 + $0x90] ss:$8 sps:$4 sm:$0xff]   ;;  %v1083_v59 = vld [vmem:[#allocation5 + $0xe0] ss:$8 sps:$4 sm:$0xff]  }
  0x38   :  { %336 = vmatpush1.bf16.msra.mxu0 %v1020_v18  ;;  %582 = vmatprep.subr.bf16.mxu1 %v1063_v32  ;;  %v1051_v58 = vld [vmem:[#allocation2 + $0x84] ss:$8 sps:$4 sm:$0xff]   ;;  %v1084_v60 = vld [vmem:[#allocation5 + $0xd4] ss:$8 sps:$4 sm:$0xff]   ;;  %v1053_v61 = vld [vmem:[#allocation2 + $0x80] ss:$8 sps:$4 sm:$0xff]  }
  0x39   :  { %337 = vmatprep.subr.bf16.mxu0 %v1021_v19  ;;  %v1086_v62 = vld [vmem:[#allocation5 + $0xd0] ss:$8 sps:$4 sm:$0xff]   ;;  %v1087_v63 = vld [vmem:[#allocation5 + $0xc4] ss:$8 sps:$4 sm:$0xff]   ;;  %v1089_v0 = vld [vmem:[#allocation5 + $0xc0] ss:$8 sps:$4 sm:$0xff]  }
  0x3a   :  { %v1090_v1 = vld [vmem:[#allocation5 + $0xb4] ss:$8 sps:$4 sm:$0xff]   ;;  %v1092_v2 = vld [vmem:[#allocation5 + $0xb0] ss:$8 sps:$4 sm:$0xff]   ;;  %v1093_v3 = vld [vmem:[#allocation5 + $0xa4] ss:$8 sps:$4 sm:$0xff]  }
  0x3b   :  { %583 = vmatpush1.bf16.msra.mxu1 %v1065_v35  ;;  %v1095_v4 = vld [vmem:[#allocation5 + $0xa0] ss:$8 sps:$4 sm:$0xff]   ;;  %v76_v9 = vadd.s32 128, %v75_v6  ;;  %v1243_v13 = vmov 0.0   ;;  %v1096_v18 = vld [vmem:[#allocation5 + $0x94] ss:$8 sps:$4 sm:$0xff]  }
  0x3c   :  { %338 = vmatpush1.bf16.msra.mxu0 %v1023_v20  ;;  %584 = vmatprep.subr.bf16.mxu1 %v1066_v36  ;;  %v1098_v19 = vld [vmem:[#allocation5 + $0x90] ss:$8 sps:$4 sm:$0xff]   ;;  %v1099_v20 = vld [vmem:[#allocation5 + $0x84] ss:$8 sps:$4 sm:$0xff]   ;;  %v1104_v23 = vld [vmem:[#allocation7 + $0x74] ss:$8 sps:$4 sm:$0xff]  }
  0x3d   :  { %339 = vmatprep.subr.bf16.mxu0 %v1024_v21  ;;  %v1101_v21 = vld [vmem:[#allocation5 + $0x80] ss:$8 sps:$4 sm:$0xff]   ;;  %v1102_v22 = vld [vmem:[#allocation7 + $0x70] ss:$8 sps:$4 sm:$0xff]   ;;  %v1107_v24 = vld [vmem:[#allocation7 + $0x64] ss:$8 sps:$4 sm:$0xff]  }
  0x3e   :  { %v1108_v27 = vld [vmem:[#allocation7 + $0x50] ss:$8 sps:$4 sm:$0xff]   ;;  %v1113_v28 = vld [vmem:[#allocation7 + $0x44] ss:$8 sps:$4 sm:$0xff]  }
  0x3f   :  { %585 = vmatpush1.bf16.msra.mxu1 %v1068_v39  ;;  %v1114_v31 = vld [vmem:[#allocation7 + $0x30] ss:$8 sps:$4 sm:$0xff]   ;;  %v1119_v32 = vld [vmem:[#allocation7 + $0x24] ss:$8 sps:$4 sm:$0xff]  }
  0x40   :  { %340 = vmatpush1.bf16.msra.mxu0 %v1026_v25  ;;  %586 = vmatprep.subr.bf16.mxu1 %v1069_v41  ;;  %v1105_v25 = vld [vmem:[#allocation7 + $0x60] ss:$8 sps:$4 sm:$0xff]   ;;  %v1120_v35 = vld [vmem:[#allocation7 + $0x10] ss:$8 sps:$4 sm:$0xff]   ;;  %v1125_v36 = vld [vmem:[#allocation7 + $0x4] ss:$8 sps:$4 sm:$0xff]  }
  0x41   :  { %341 = vmatprep.subr.bf16.mxu0 %v1027_v26  ;;  %v1110_v26 = vld [vmem:[#allocation7 + $0x54] ss:$8 sps:$4 sm:$0xff]   ;;  %v1126_v39 = vld [vmem:[#allocation7 + $0xf0] ss:$8 sps:$4 sm:$0xff]   ;;  %v1129_v41 = vld [vmem:[#allocation7 + $0xe0] ss:$8 sps:$4 sm:$0xff]  }
  0x43   :  { %587 = vmatpush1.bf16.msra.mxu1 %v1071_v43  ;;  %v1132_v43 = vld [vmem:[#allocation7 + $0xd0] ss:$8 sps:$4 sm:$0xff]  }
  0x44   :  { %342 = vmatpush1.bf16.msra.mxu0 %v1029_v29  ;;  %588 = vmatprep.subr.bf16.mxu1 %v1072_v44  ;;  %v1111_v29 = vld [vmem:[#allocation7 + $0x40] ss:$8 sps:$4 sm:$0xff]   ;;  %v1137_v44 = vld [vmem:[#allocation7 + $0xc4] ss:$8 sps:$4 sm:$0xff]  }
  0x45   :  { %343 = vmatprep.subr.bf16.mxu0 %v1030_v30  ;;  %v1116_v30 = vld [vmem:[#allocation7 + $0x34] ss:$8 sps:$4 sm:$0xff]  }
  0x47   :  { %589 = vmatpush1.bf16.msra.mxu1 %v1074_v47  ;;  %v1138_v47 = vld [vmem:[#allocation7 + $0xb0] ss:$8 sps:$4 sm:$0xff]  }
  0x48   :  { %344 = vmatpush2.bf16.msra.mxu0 %v1032_v33  ;;  %590 = vmatprep.subr.bf16.mxu1 %v1075_v48  ;;  %v1117_v33 = vld [vmem:[#allocation7 + $0x20] ss:$8 sps:$4 sm:$0xff]   ;;  %v1143_v48 = vld [vmem:[#allocation7 + $0xa4] ss:$8 sps:$4 sm:$0xff]  }
  0x49   :  { %345 = vmatprep.subr.bf16.mxu0 %v1033_v34  ;;  %v1122_v34 = vld [vmem:[#allocation7 + $0x14] ss:$8 sps:$4 sm:$0xff]  }
  0x4b   :  { %591 = vmatpush1.bf16.msra.mxu1 %v1077_v51 }
  0x4c   :  { %346 = vmatpush2.bf16.msra.mxu0 %v1035_v37  ;;  %592 = vmatprep.subr.bf16.mxu1 %v1078_v52  ;;  %v1123_v37 = vld [vmem:[#allocation7] ss:$8 sps:$4 sm:$0xff]  }
  0x4d   :  { %347 = vmatprep.subr.bf16.mxu0 %v1036_v38  ;;  %v1128_v38 = vld [vmem:[#allocation7 + $0xf4] ss:$8 sps:$4 sm:$0xff]   ;;  %v155_v52 = vld [vmem:[%s1331_s4] sm:$0x3] }
  0x4f   :  { %593 = vmatpush2.bf16.msra.mxu1 %v1080_v55 }
  0x50   :  { %348 = vmatpush2.bf16.msra.mxu0 %v1038_v40  ;;  %594 = vmatprep.subr.bf16.mxu1 %v1081_v56  ;;  %v1131_v40 = vld [vmem:[#allocation7 + $0xe4] ss:$8 sps:$4 sm:$0xff]  }
  0x51   :  { %349 = vmatprep.subr.bf16.mxu0 %v1039_v42  ;;  %v1134_v42 = vld [vmem:[#allocation7 + $0xd4] ss:$8 sps:$4 sm:$0xff]  }
  0x53   :  { %595 = vmatpush2.bf16.msra.mxu1 %v1083_v59 }
  0x54   :  { %350 = vmatpush2.bf16.msra.mxu0 %v1041_v45  ;;  %596 = vmatprep.subr.bf16.mxu1 %v1084_v60  ;;  %v1135_v45 = vld [vmem:[#allocation7 + $0xc0] ss:$8 sps:$4 sm:$0xff]  }
  0x55   :  { %351 = vmatprep.subr.bf16.mxu0 %v1042_v46  ;;  %v1140_v46 = vld [vmem:[#allocation7 + $0xb4] ss:$8 sps:$4 sm:$0xff]  }
  0x57   :  { %597 = vmatpush2.bf16.msra.mxu1 %v1086_v62 }
  0x58   :  { %352 = vmatpush2.bf16.msra.mxu0 %v1044_v49  ;;  %598 = vmatprep.subr.bf16.mxu1 %v1087_v63  ;;  %v1141_v49 = vld [vmem:[#allocation7 + $0xa0] ss:$8 sps:$4 sm:$0xff]  }
  0x59   :  { %353 = vmatprep.subr.bf16.mxu0 %v1045_v50  ;;  %v158_v50 = vshrl.u32 %v74_v5, 7  ;;  %v1147_v5 = vld [vmem:[#allocation7 + $0x80] ss:$8 sps:$4 sm:$0xff]  }
  0x5b   :  { %599 = vmatpush2.bf16.msra.mxu1 %v1089_v0  ;;  %v159_v51 = vsub.s32 0, %v158_v50 }
  0x5c   :  { %354 = vmatpush2.bf16.msra.mxu0 %v1047_v53  ;;  %600 = vmatprep.subr.bf16.mxu1 %v1090_v1  ;;  %v163_v53 = vsub.s32 1, %v158_v50 }
  0x5d   :  { %355 = vmatprep.subr.bf16.mxu0 %v1048_v54  ;;  %v160_v54 = vrot.slane %v155_v52, %v159_v51 }
  0x5e   :  { %v164_v55 = vrot.slane %v155_v52, %v163_v53 }
  0x5f   :  { %601 = vmatpush2.bf16.msra.mxu1 %v1092_v2  ;;  %v1146_v2 = vld [vmem:[#allocation7 + $0x94] ss:$8 sps:$4 sm:$0xff]  }
  0x60   :  { %356 = vmatpush2.bf16.msra.mxu0 %v1050_v57  ;;  %602 = vmatprep.subr.bf16.mxu1 %v1093_v3  ;;  %v1144_v3 = vld [vmem:[#allocation7 + $0x90] ss:$8 sps:$4 sm:$0xff]  }
  0x61   :  { %357 = vmatprep.subr.bf16.mxu0 %v1051_v58 }
  0x63   :  { %603 = vmatpush2.bf16.msra.mxu1 %v1095_v4  ;;  %v1149_v4 = vld [vmem:[#allocation7 + $0x84] ss:$8 sps:$4 sm:$0xff]  }
  0x64   :  { %358 = vmatpush2.bf16.msra.mxu0 %v1053_v61  ;;  %604 = vmatprep.subr.bf16.mxu1 %v1096_v18 }
  0x65   :  { %825 = vmatprep.subr.bf16.mxu0 %v1104_v23 }
  0x67   :  { %605 = vmatpush2.bf16.msra.mxu1 %v1098_v19  ;;  %v653_v19 = vld [vmem:[%s1335_s8] sm:$0x3] }
  0x68   :  { %606 = vmatprep.subr.bf16.mxu1 %v1099_v20  ;;  %v658_v20 = vrot.slane %v653_v19, %v159_v51 }
  0x6b   :  { %607 = vmatpush2.bf16.msra.mxu1 %v1101_v21  ;;  %v662_v21 = vrot.slane %v653_v19, %v163_v53 }
  0xa2   :  { %v82_v7 = vpop.permute.xlu0 %81 }
  0xa3   :  { %vm83_vm0 = vcmp.eq.s32.totalorder %v82_v7, %v75_v6  ;;  %vm84_vm1 = vcmp.eq.s32.totalorder %v82_v7, %v76_v9 }
  0xa4   :  { %v96_v8 = vpop.permute.xlu1 %95 }
  0xa5   :  { %vm97_vm5 = vcmp.eq.s32.totalorder %v96_v8, %v75_v6  ;;  %vm98_vm7 = vcmp.eq.s32.totalorder %v96_v8, %v76_v9 }
  0xa7   :  { %v88_v10 = vpop.permute.xlu0 %87 }
  0xa8   :  { %vm89_vm2 = vcmp.eq.s32.totalorder %v88_v10, %v75_v6  ;;  %vm90_vm3 = vcmp.eq.s32.totalorder %v88_v10, %v76_v9 }
  0xa9   :  { %vm91_vm4 = vmor %vm83_vm0, %vm89_vm2  ;;  %v104_v11 = vpop.permute.xlu1 %103 }
  0xaa   :  { %vm92_vm6 = vmor %vm84_vm1, %vm90_vm3  ;;  %vm105_vm9 = vcmp.eq.s32.totalorder %v104_v11, %v75_v6  ;;  %vm106_vm11 = vcmp.eq.s32.totalorder %v104_v11, %v76_v9 }
  0xab   :  { %vm99_vm8 = vmor %vm91_vm4, %vm97_vm5 }
  0xac   :  { %vm100_vm10 = vmor %vm92_vm6, %vm98_vm7 }
  0xad   :  { %vm107_vm12 = vmor %vm99_vm8, %vm105_vm9 }
  0xae   :  { %v112_v12 = vpop.permute.xlu1 %111  ;;  %vm108_vm15 = vmor %vm100_vm10, %vm106_vm11 }
  0xaf   :  { %vm113_vm13 = vcmp.eq.s32.totalorder %v112_v12, %v75_v6  ;;  %vm114_vm14 = vcmp.eq.s32.totalorder %v112_v12, %v76_v9  ;;  %v404_v6 = vld [vmem:[%s1333_s6] sm:$0x3]  ;;  %s1244_s6 = smov [#allocation8]  }
  0xb0   :  { %vm115_vm0 = vmor %vm107_vm12, %vm113_vm13  ;;  %v409_v7 = vrot.slane %v404_v6, %v159_v51  ;;  %v413_v8 = vrot.slane %v404_v6, %v163_v53  ;;  %s881_s10 = sshll.u32 %s1244_s6, 4  ;;  %s882_s10 = int_to_ptr.vmem [resolvable:$true] %s881_s10 }
  0xb1   :  { %vm116_vm2 = vmor %vm108_vm15, %vm114_vm14  ;;  %v891_v14 = vsel %vm115_vm0, 1.0, %v1243_v13  ;;  %s1210_s11 = scalar_lea.vmem %s882_s10, 128  ;;  %p1215_p2 = scmp.lt.s32.totalorder %s882_s10, %s882_s10 }
  0xb2   :  { %v892_v15 = vsel %vm116_vm2, 1.0, %v1243_v13  ;;  %v121_v16 = vpack.c.bf16 %v891_v14, %v891_v14  ;;  %p1211_p1 = scmp.ne.s32.totalorder %s882_s10, %s1210_s11  ;;  %p1216_p3 = scmp.lt.s32.totalorder %s1210_s11, %s1210_s11 }
  0xb3   :  { %v122_v17 = vpack.c.bf16 %v892_v15, %v892_v15 }
  0xb4   :  { %p1217_p4 = por %p1216_p3, %p1215_p2 }
  0xb5   :  { %359 = vmatprep.mubr.bf16.mxu0 %v122_v17 }
  0xb6   :  { %360 = vmatmul.mubr.bf16.vlgmr.msra.gmra.mxu0 %v121_v16  ;;  %p1218_p5 = pnand %p1217_p4, %p1211_p1 }
  0xb7   :  { %826 = vmatpush1.bf16.msra.mxu0 %v1102_v22 }
  0xb8   :  { %827 = vmatprep.subr.bf16.mxu0 %v1107_v24 }
  0xbb   :  { %828 = vmatpush1.bf16.msra.mxu0 %v1105_v25 }
  0xbc   :  { %829 = vmatprep.subr.bf16.mxu0 %v1110_v26 }
  0xbf   :  { %830 = vmatpush1.bf16.msra.mxu0 %v1108_v27 }
  0xc0   :  { %831 = vmatprep.subr.bf16.mxu0 %v1113_v28 }
  0xc3   :  { %832 = vmatpush1.bf16.msra.mxu0 %v1111_v29 }
  0xc4   :  { %833 = vmatprep.subr.bf16.mxu0 %v1116_v30 }
  0xc7   :  { %834 = vmatpush1.bf16.msra.mxu0 %v1114_v31 }
  0xc8   :  { %835 = vmatprep.subr.bf16.mxu0 %v1119_v32 }
  0xcb   :  { %836 = vmatpush1.bf16.msra.mxu0 %v1117_v33 }
  0xcc   :  { %837 = vmatprep.subr.bf16.mxu0 %v1122_v34 }
  0xcf   :  { %838 = vmatpush1.bf16.msra.mxu0 %v1120_v35 }
  0xd0   :  { %839 = vmatprep.subr.bf16.mxu0 %v1125_v36 }
  0xd3   :  { %840 = vmatpush1.bf16.msra.mxu0 %v1123_v37 }
  0xd4   :  { %841 = vmatprep.subr.bf16.mxu0 %v1128_v38 }
  0xd7   :  { %842 = vmatpush2.bf16.msra.mxu0 %v1126_v39 }
  0xd8   :  { %843 = vmatprep.subr.bf16.mxu0 %v1131_v40 }
  0xdb   :  { %844 = vmatpush2.bf16.msra.mxu0 %v1129_v41 }
  0xdc   :  { %845 = vmatprep.subr.bf16.mxu0 %v1134_v42 }
  0xdf   :  { %846 = vmatpush2.bf16.msra.mxu0 %v1132_v43 }
  0xe0   :  { %847 = vmatprep.subr.bf16.mxu0 %v1137_v44 }
  0xe3   :  { %848 = vmatpush2.bf16.msra.mxu0 %v1135_v45 }
  0xe4   :  { %849 = vmatprep.subr.bf16.mxu0 %v1140_v46 }
  0xe7   :  { %850 = vmatpush2.bf16.msra.mxu0 %v1138_v47 }
  0xe8   :  { %851 = vmatprep.subr.bf16.mxu0 %v1143_v48 }
  0xeb   :  { %852 = vmatpush2.bf16.msra.mxu0 %v1141_v49 }
  0xec   :  { %853 = vmatprep.subr.bf16.mxu0 %v1146_v2 }
  0xef   :  { %854 = vmatpush2.bf16.msra.mxu0 %v1144_v3 }
  0xf0   :  { %855 = vmatprep.subr.bf16.mxu0 %v1149_v4 }
  0xf3   :  { %856 = vmatpush2.bf16.msra.mxu0 %v1147_v5 }
 0x176   :  { %v361_v56 = vpop.f32.mrf.mxu0 }
 0x177   :  { %v362_v57 = vadd.f32 %v361_v56, %v160_v54 }
 0x178   :  { %v363_v58 = vpop.f32.mrf.mxu0 }
 0x179   :  { %v364_v59 = vadd.f32 %v363_v58, %v164_v55  ;;  %v368_v60 = vmax.f32 %v362_v57, 0.0 }
 0x17a   :  { %v365_v61 = vpop.f32.mrf.mxu0 }
 0x17b   :  { %v369_v62 = vmax.f32 %v364_v59, 0.0  ;;  %v370_v1 = vpack.c.bf16 %v368_v60, %v368_v60 }
 0x17c   :  { %v366_v63 = vpop.f32.mrf.mxu0 }
 0x17d   :  { %v371_v0 = vpack.c.bf16 %v369_v62, %v369_v62 }
 0x17f   :  { %608 = vmatprep.mubr.bf16.mxu1 %v371_v0 }
 0x180   :  { %609 = vmatmul.mubr.bf16.vlgmr.msra.gmra.mxu1 %v370_v1 }
 0x240   :  { %v610_v9 = vpop.f32.mrf.mxu1 }
 0x241   :  { %v611_v10 = vadd.f32 %v610_v9, %v409_v7 }
 0x242   :  { %v612_v11 = vpop.f32.mrf.mxu1 }
 0x243   :  { %v613_v12 = vadd.f32 %v612_v11, %v413_v8  ;;  %v617_v13 = vmax.f32 %v611_v10, 0.0 }
 0x244   :  { %v614_v14 = vpop.f32.mrf.mxu1 }
 0x245   :  { %v618_v15 = vmax.f32 %v613_v12, 0.0  ;;  %v619_v18 = vpack.c.bf16 %v617_v13, %v617_v13 }
 0x246   :  { %v615_v16 = vpop.f32.mrf.mxu1 }
 0x247   :  { %v620_v17 = vpack.c.bf16 %v618_v15, %v618_v15 }
 0x249   :  { %857 = vmatprep.mubr.bf16.mxu0 %v620_v17 }
 0x24a   :  { %858 = vmatmul.mubr.bf16.vlgmr.msra.gmra.mxu0 %v619_v18 }
 0x30a   :  { %v859_v22 = vpop.f32.mrf.mxu0 }
 0x30b   :  { %v860_v24 = vadd.f32 %v859_v22, %v658_v20 }
 0x30c   :  { %v861_v23 = vpop.f32.mrf.mxu0 }
 0x30d   :  { %v862_v25 = vadd.f32 %v861_v23, %v662_v21 }
 0x30e   :  { %v863_v26 = vpop.f32.mrf.mxu0 }
 0x30f   :  { %v990_v27 = vpack.c.bf16 %v862_v25, %v860_v24 }
 0x310   :  { %v864_v28 = vpop.f32.mrf.mxu0 }
 0x311   :  { %874 = vst [vmem:[#allocation8] sm:$0xff] %v990_v27 }
 0x312   :  { %1221 = shalt.err (!%p1218_p5)
}
 0x313   :  { %884 = dma.vmem_to_hbm [thread:$0]  %s882_s10, 128, %s1336_s9, [#allocation4]  }
 0x314   :  { %1234 = dma.done.wait [#allocation4], 128  }
 0x315   :  { %1235 = vsyncadd [#allocation4], 4294967168 }
 0x316   :  { %888 = vsyncpa [#allocation3], 1 }
 0x317   :  { %889 = vsyncpa [#allocation6], 1 }
 0x318   :  { %890 = vsyncpa [#allocation4], 1 }

</bundles_post_ra>
